<compile_context>
chip_gen: v6e
topology: v6e:2x2x1
jax: 0.10.0
libtpu: 0.0.40
codegen_flags: <defaults>
</compile_context>

<pallas_src>
import jax
import jax.numpy as jnp
from jax.experimental import pallas as pl
from jax.experimental.pallas import tpu as pltpu


def _round_up(x, m):
    return ((x + m - 1) // m) * m


def _mlp_predictor_kernel(alpha_ref, x_ref, w1_ref, b1_ref, w2_ref, b2_ref, o_ref):
    # First linear: (bn, Din) @ (Din, H) + (1, H); f32 accumulation on the MXU,
    # HIGHEST precision for strict f32 parity with the PyTorch reference.
    h = jnp.dot(x_ref[...], w1_ref[...],
                preferred_element_type=jnp.float32,
                precision=jax.lax.Precision.HIGHEST)
    h = h + b1_ref[...]
    # PReLU with a single shared scalar parameter, read from SMEM.
    alpha = alpha_ref[0]
    h = jnp.where(h >= 0, h, alpha * h)
    # Second linear stays in f32.
    y = jnp.dot(h, w2_ref[...],
                preferred_element_type=jnp.float32,
                precision=jax.lax.Precision.HIGHEST)
    y = y + b2_ref[...]
    o_ref[...] = y.astype(o_ref.dtype)


def _choose_block_n(n_rows, block_n):
    """Pick the batch tile: large (DMA-dominant), sublane-aligned, and giving
    the grid >= 2 blocks when there is enough work (feeds both v7x TCs)."""
    bn = min(int(block_n), n_rows)
    if bn < n_rows:
        # Tile smaller than the array: last-two-dims rule needs a multiple of 8.
        bn = _round_up(bn, 8)
    if n_rows > 16 and pl.cdiv(n_rows, bn) < 2:
        half = _round_up(pl.cdiv(n_rows, 2), 8)
        if half < n_rows:
            bn = half
    return max(bn, 1)


def mlp_predictor(x, w1, b1, alpha, w2, b2, *, block_n=2048):
    """Fused MLP predictor forward.

    x:     (N, Din)
    w1:    (Din, H)   b1: (H,)
    alpha: scalar (PReLU single parameter)
    w2:    (H, Dout)  b2: (Dout,)
    returns (N, Dout)
    """
    N, Din = x.shape
    H = w1.shape[1]
    Dout = w2.shape[1]
    out_dtype = x.dtype

    bn = _choose_block_n(N, block_n)
    grid = (pl.cdiv(N, bn),)

    b1_2d = b1.reshape(1, H).astype(jnp.float32)
    b2_2d = b2.reshape(1, Dout).astype(jnp.float32)
    alpha_sm = jnp.asarray(alpha, jnp.float32).reshape(1)  # (1,) f32 scalar in SMEM

    # Advisory cost for XLA's scheduler around the custom call.
    isz = jnp.dtype(out_dtype).itemsize
    flops = 2 * N * Din * H + 2 * N * H * Dout
    bytes_accessed = (
        x.size * jnp.dtype(x.dtype).itemsize
        + w1.size * jnp.dtype(w1.dtype).itemsize
        + w2.size * jnp.dtype(w2.dtype).itemsize
        + (H + Dout) * 4
        + N * Dout * isz
    )

    # Raise the scoped-VMEM limit only when huge tiles would exceed v5e's
    # 16 MiB default (double-buffered x + out, plus resident weights/biases).
    vmem_need = 2 * 2 * bn * (Din + Dout) * 4 + (Din * H + H * Dout + H + Dout) * 4
    cp_kwargs = dict(dimension_semantics=("parallel",))
    if vmem_need > 12 * 1024 * 1024:
        cp_kwargs["vmem_limit_bytes"] = int(2 * vmem_need)

    out = pl.pallas_call(
        _mlp_predictor_kernel,
        out_shape=jax.ShapeDtypeStruct((N, Dout), out_dtype),
        grid_spec=pltpu.PrefetchScalarGridSpec(
            num_scalar_prefetch=0,
            grid=grid,
            in_specs=[
                pl.BlockSpec(memory_space=pltpu.MemorySpace.SMEM),  # alpha scalar
                pl.BlockSpec((bn, Din), lambda i: (i, 0)),          # x tile
                pl.BlockSpec((Din, H), lambda i: (0, 0)),           # w1 (resident)
                pl.BlockSpec((1, H), lambda i: (0, 0)),             # b1 (resident)
                pl.BlockSpec((H, Dout), lambda i: (0, 0)),          # w2 (resident)
                pl.BlockSpec((1, Dout), lambda i: (0, 0)),          # b2 (resident)
            ],
            out_specs=pl.BlockSpec((bn, Dout), lambda i: (i, 0)),
        ),
        compiler_params=pltpu.CompilerParams(**cp_kwargs),
        cost_estimate=pl.CostEstimate(
            flops=int(flops), transcendentals=0,
            bytes_accessed=int(bytes_accessed)),
    )(alpha_sm, x, w1, b1_2d, w2, b2_2d)

    return out


def _init_linear(key, fan_in, fan_out):
    """Init mimicking torch.nn.Linear.reset_parameters.

    kaiming_uniform_(a=sqrt(5)) => bound = 1/sqrt(fan_in); bias bound likewise.
    """
    kw, kb = jax.random.split(key)
    bound = 1.0 / (fan_in ** 0.5)
    w = jax.random.uniform(kw, (fan_in, fan_out), jnp.float32, -bound, bound)
    b = jax.random.uniform(kb, (fan_out,), jnp.float32, -bound, bound)
    return w, b


def reference_forward(x, w1, b1, alpha, w2, b2):
    hp = jax.lax.Precision.HIGHEST
    h = jnp.dot(x, w1, precision=hp) + b1
    h = jnp.where(h >= 0, h, alpha * h)
    return jnp.dot(h, w2, precision=hp) + b2


if __name__ == "__main__":
    # Small shapes consistent with the module: input_size=32, hidden_size=64,
    # output_size=32 (hidden_size is a constructor arg; kept small for the demo).
    D_IN, HID, D_OUT = 32, 64, 32

    key = jax.random.PRNGKey(0)
    kx1, kx2, k1, k2 = jax.random.split(key, 4)

    w1, b1 = _init_linear(k1, D_IN, HID)
    w2, b2 = _init_linear(k2, HID, D_OUT)
    alpha = jnp.float32(0.25)  # PyTorch PReLU(1) default init

    # Case 1: tiny batch (single grid block, full-extent row tile).
    x_small = jax.random.normal(kx1, (8, D_IN), jnp.float32)
    y_small = jax.block_until_ready(mlp_predictor(x_small, w1, b1, alpha, w2, b2))
    y_small_ref = reference_forward(x_small, w1, b1, alpha, w2, b2)
    assert y_small.shape == (8, D_OUT)
    assert jnp.allclose(y_small, y_small_ref, atol=1e-5, rtol=1e-5)

    # Case 2: multi-block grid with a ragged last block (exercises the
    # no-padding tiling path and the >=2-block megacore split).
    x_big = jax.random.normal(kx2, (200, D_IN), jnp.float32)
    y_big = jax.block_until_ready(mlp_predictor(x_big, w1, b1, alpha, w2, b2))
    y_big_ref = reference_forward(x_big, w1, b1, alpha, w2, b2)
    assert y_big.shape == (200, D_OUT)
    assert jnp.allclose(y_big, y_big_ref, atol=1e-5, rtol=1e-5)

    # Case 3: explicit small block_n to exercise a >2-point grid.
    y_tiled = jax.block_until_ready(
        mlp_predictor(x_big, w1, b1, alpha, w2, b2, block_n=64))
    assert jnp.allclose(y_tiled, y_big_ref, atol=1e-5, rtol=1e-5)

    print("KERNEL_OK")
</pallas_src>

<mosaic_0001>
module attributes {stable_mosaic.version = 11 : i64} {
  func.func @_mlp_predictor_kernel(%arg0: i32, %arg1: memref<1xf32, #tpu.memory_space<smem>>, %arg2: memref<8x32xf32, #tpu.memory_space<vmem>>, %arg3: memref<32x64xf32, #tpu.memory_space<vmem>>, %arg4: memref<1x64xf32, #tpu.memory_space<vmem>>, %arg5: memref<64x32xf32, #tpu.memory_space<vmem>>, %arg6: memref<1x32xf32, #tpu.memory_space<vmem>>, %arg7: memref<8x32xf32, #tpu.memory_space<vmem>>) attributes {dimension_semantics = [#tpu.dimension_semantics<parallel>], iteration_bounds = array<i64: 1>, scalar_prefetch = 0 : i64, scratch_operands = 0 : i64, tpu.core_type = #tpu.core_type<tc>, window_params = [{transform_indices = @transform_0, window_bounds = array<i64: 1>}, {transform_indices = @transform_1, window_bounds = array<i64: 8, 32>}, {pipeline_mode = #tpu.pipeline_mode<synchronous>, transform_indices = @transform_2, window_bounds = array<i64: 32, 64>}, {pipeline_mode = #tpu.pipeline_mode<synchronous>, transform_indices = @transform_3, window_bounds = array<i64: 1, 64>}, {pipeline_mode = #tpu.pipeline_mode<synchronous>, transform_indices = @transform_4, window_bounds = array<i64: 64, 32>}, {pipeline_mode = #tpu.pipeline_mode<synchronous>, transform_indices = @transform_5, window_bounds = array<i64: 1, 32>}, {transform_indices = @transform_6, window_bounds = array<i64: 8, 32>}]} {
    %c0 = arith.constant 0 : index
    %c0_0 = arith.constant 0 : index
    %0 = vector.load %arg2[%c0, %c0_0] : memref<8x32xf32, #tpu.memory_space<vmem>>, vector<8x32xf32>
    %c0_1 = arith.constant 0 : index
    %c0_2 = arith.constant 0 : index
    %1 = vector.load %arg3[%c0_1, %c0_2] : memref<32x64xf32, #tpu.memory_space<vmem>>, vector<32x64xf32>
    %cst = arith.constant dense<0.000000e+00> : vector<8x64xf32>
    %2 = tpu.matmul %0, %1, %cst {dimension_numbers = #tpu.dot_dimension_numbers<[1], [0], [0], [1], [0, 0, 1, 1], [], []>, precision = #tpu.contract_precision<fp32>} : vector<8x32xf32>, vector<32x64xf32>, vector<8x64xf32> -> vector<8x64xf32>
    %c0_3 = arith.constant 0 : index
    %c0_4 = arith.constant 0 : index
    %3 = vector.load %arg4[%c0_3, %c0_4] : memref<1x64xf32, #tpu.memory_space<vmem>>, vector<1x64xf32>
    %4 = vector.broadcast %3 : vector<1x64xf32> to vector<8x64xf32>
    %5 = arith.addf %2, %4 : vector<8x64xf32>
    %c0_5 = arith.constant 0 : index
    %6 = memref.load %arg1[%c0_5] : memref<1xf32, #tpu.memory_space<smem>>
    %cst_6 = arith.constant 0.000000e+00 : f32
    %7 = vector.broadcast %cst_6 : f32 to vector<8x64xf32>
    %8 = arith.cmpf oge, %5, %7 : vector<8x64xf32>
    %9 = vector.broadcast %6 : f32 to vector<8x64xf32>
    %10 = arith.mulf %9, %5 : vector<8x64xf32>
    %11 = arith.select %8, %5, %10 : vector<8x64xi1>, vector<8x64xf32>
    %c0_7 = arith.constant 0 : index
    %c0_8 = arith.constant 0 : index
    %12 = vector.load %arg5[%c0_7, %c0_8] : memref<64x32xf32, #tpu.memory_space<vmem>>, vector<64x32xf32>
    %cst_9 = arith.constant dense<0.000000e+00> : vector<8x32xf32>
    %13 = tpu.matmul %11, %12, %cst_9 {dimension_numbers = #tpu.dot_dimension_numbers<[1], [0], [0], [1], [0, 0, 1, 1], [], []>, precision = #tpu.contract_precision<fp32>} : vector<8x64xf32>, vector<64x32xf32>, vector<8x32xf32> -> vector<8x32xf32>
    %c0_10 = arith.constant 0 : index
    %c0_11 = arith.constant 0 : index
    %14 = vector.load %arg6[%c0_10, %c0_11] : memref<1x32xf32, #tpu.memory_space<vmem>>, vector<1x32xf32>
    %15 = vector.broadcast %14 : vector<1x32xf32> to vector<8x32xf32>
    %16 = arith.addf %13, %15 : vector<8x32xf32>
    %c0_12 = arith.constant 0 : index
    %c0_13 = arith.constant 0 : index
    %17 = vector.load %arg7[%c0_12, %c0_13] : memref<8x32xf32, #tpu.memory_space<vmem>>, vector<8x32xf32>
    tpu.vector_store %arg7[%c0_12, %c0_13], %16 {strides = array<i32>} : memref<8x32xf32, #tpu.memory_space<vmem>>, vector<8x32xf32>,
    return
  }
  func.func @transform_0(%arg0: i32) -> i32 {
    %c0_i32 = arith.constant 0 : i32
    %c0_i32_0 = arith.constant 0 : i32
    return %c0_i32 : i32
  }
  func.func @transform_1(%arg0: i32) -> (i32, i32) {
    %c0_i32 = arith.constant 0 : i32
    %c0_i32_0 = arith.constant 0 : i32
    return %arg0, %c0_i32 : i32, i32
  }
  func.func @transform_2(%arg0: i32) -> (i32, i32) {
    %c0_i32 = arith.constant 0 : i32
    %c0_i32_0 = arith.constant 0 : i32
    %c0_i32_1 = arith.constant 0 : i32
    return %c0_i32, %c0_i32_0 : i32, i32
  }
  func.func @transform_3(%arg0: i32) -> (i32, i32) {
    %c0_i32 = arith.constant 0 : i32
    %c0_i32_0 = arith.constant 0 : i32
    %c0_i32_1 = arith.constant 0 : i32
    return %c0_i32, %c0_i32_0 : i32, i32
  }
  func.func @transform_4(%arg0: i32) -> (i32, i32) {
    %c0_i32 = arith.constant 0 : i32
    %c0_i32_0 = arith.constant 0 : i32
    %c0_i32_1 = arith.constant 0 : i32
    return %c0_i32, %c0_i32_0 : i32, i32
  }
  func.func @transform_5(%arg0: i32) -> (i32, i32) {
    %c0_i32 = arith.constant 0 : i32
    %c0_i32_0 = arith.constant 0 : i32
    %c0_i32_1 = arith.constant 0 : i32
    return %c0_i32, %c0_i32_0 : i32, i32
  }
  func.func @transform_6(%arg0: i32) -> (i32, i32) {
    %c0_i32 = arith.constant 0 : i32
    %c0_i32_0 = arith.constant 0 : i32
    return %arg0, %c0_i32 : i32, i32
  }
}

</mosaic_0001>

<bundles_post_ra>
// kernel: tpu_custom_call.1
= control target key start
LH: loop header
LB: loop body
LE: loop exit
PB: predicated region body
PF: predicated region fallthrough
CT: control target
= control target key end

     0   :  { %vm37_vm0 = vcmask 261120   ;;  %v1393_v3 = vmov 0.0   ;;  %vm1394_vm1 = vmmov 0   ;;  %s1736_s0 = inlined_call_operand.<no memory space> [shape: f32[1], index: 0, kind: input, shape index: {}]   ;;  %s1737_s1 = inlined_call_operand.vmem [shape: f32[8,32], index: 1, kind: input, shape index: {}]   ;;  %s1738_s2 = inlined_call_operand.vmem [shape: f32[32,64], index: 2, kind: input, shape index: {}]   ;;  %s1739_s3 = inlined_call_operand.vmem [shape: f32[1,64], index: 3, kind: input, shape index: {}]   ;;  %s1740_s4 = inlined_call_operand.vmem [shape: f32[64,32], index: 4, kind: input, shape index: {}]   ;;  %s1741_s5 = inlined_call_operand.vmem [shape: f32[1,32], index: 5, kind: input, shape index: {}]   ;;  %s1742_s6 = inlined_call_operand.hbm [shape: f32[8,32], index: 6, kind: output, shape index: {}]  }
   0x1   :  { %v29_v0 = vld [vmem:[%s1738_s2 + $0x18] sm:$0xff]  ;;  %v28_v1 = vld [vmem:[%s1738_s2 + $0x10] sm:$0xff]  ;;  %v27_v2 = vld [vmem:[%s1738_s2 + $0x8] sm:$0xff]  ;;  %1188 = vmatprep.subr.mxu0 %v1393_v3  ;;  %1199 = vmatprep.subr.mxu1 %v1393_v3 }
   0x2   :  { %v1441_v4 = vand.u32 4294901760, %v29_v0  ;;  %v1443_v5 = vand.u32 4294901760, %v28_v1  ;;  %v1445_v6 = vand.u32 4294901760, %v27_v2  ;;  %v26_v7 = vld [vmem:[%s1738_s2] sm:$0xff]  ;;  %1196 = vmatprep.mubr.msk.f32.mxu0 %vm1394_vm1, %v1393_v3  ;;  %1207 = vmatprep.mubr.msk.f32.mxu1 %vm1394_vm1, %v1393_v3 }
   0x3   :  { %v25_v8 = vld [vmem:[%s1737_s1] sm:$0xff]  ;;  %v1454_v9 = vand.u32 4294901760, %v26_v7 }
   0x4   :  { %v39_v10 = vsel %vm37_vm0, %v25_v8, 0 }
   0x5   :  { %12 = vsyncpa [#allocation4], 0  ;;  %1189 = vmatpush3.msra.mxu0 %v1441_v4  ;;  %v146_v11 = vsub.f32 %v29_v0, %v1441_v4  ;;  %v1463_v12 = vand.u32 4294901760, %v39_v10  ;;  %v153_v13 = vsub.f32 %v28_v1, %v1443_v5  ;;  %v160_v14 = vsub.f32 %v27_v2, %v1445_v6  ;;  %v538_v32 = vld [vmem:[%s1740_s4 + $0x38] sm:$0xff]  ;;  %v537_v34 = vld [vmem:[%s1740_s4 + $0x30] sm:$0xff]  ;;  %s1395_s24 = smov [#allocation3]  }
   0x6   :  { %1190 = vmatprep.subr.mxu0 %v1393_v3  ;;  %v167_v15 = vsub.f32 %v26_v7, %v1454_v9  ;;  %v1522_v33 = vand.u32 4294901760, %v538_v32  ;;  %v1530_v36 = vand.u32 4294901760, %v537_v34  ;;  %v536_v37 = vld [vmem:[%s1740_s4 + $0x28] sm:$0xff]  ;;  %v535_v41 = vld [vmem:[%s1740_s4 + $0x20] sm:$0xff]  ;;  %v534_v46 = vld [vmem:[%s1740_s4 + $0x18] sm:$0xff]  ;;  %vm546_vm3 = vcmask 523264  }
   0x7   :  { %1191 = vmatpush3.msra.mxu0 %v1443_v5  ;;  %v147_v16 = vand.u32 4294901760, %v146_v11  ;;  %v111_v17 = vsub.f32 %v39_v10, %v1463_v12  ;;  %v154_v18 = vand.u32 4294901760, %v153_v13  ;;  %v161_v19 = vand.u32 4294901760, %v160_v14  ;;  %v533_v52 = vld [vmem:[%s1740_s4 + $0x10] sm:$0xff]  ;;  %v532_v58 = vld [vmem:[%s1740_s4 + $0x8] sm:$0xff]  ;;  %v531_v0 = vld [vmem:[%s1740_s4] sm:$0xff] }
   0x8   :  { %1192 = vmatprep.subr.mxu0 %v1393_v3  ;;  %v168_v20 = vand.u32 4294901760, %v167_v15  ;;  %v1528_v35 = vsub.f32 %v538_v32, %v1522_v33  ;;  %v1539_v39 = vsub.f32 %v537_v34, %v1530_v36  ;;  %v1541_v40 = vand.u32 4294901760, %v536_v37  ;;  %s1094_s25 = sshll.u32 %s1395_s24, 4  ;;  %s1095_s25 = int_to_ptr.vmem [resolvable:$true] %s1094_s25 }
   0x9   :  { %1193 = vmatpush3.msra.mxu0 %v1445_v6  ;;  %v148_v21 = vsub.f32 %v146_v11, %v147_v16  ;;  %v112_v22 = vand.u32 4294901760, %v111_v17  ;;  %v155_v23 = vsub.f32 %v153_v13, %v154_v18  ;;  %v162_v24 = vsub.f32 %v160_v14, %v161_v19  ;;  %s1371_s26 = scalar_lea.vmem %s1095_s25, 128  ;;  %p1376_p1 = scmp.lt.s32.totalorder %s1095_s25, %s1095_s25 }
   0xa   :  { %1194 = vmatprep.subr.mxu0 %v1393_v3  ;;  %v169_v28 = vsub.f32 %v167_v15, %v168_v20  ;;  %v652_v38 = vand.u32 4294901760, %v1528_v35  ;;  %v659_v43 = vand.u32 4294901760, %v1539_v39  ;;  %v1553_v44 = vsub.f32 %v536_v37, %v1541_v40  ;;  %p1372_p0 = scmp.ne.s32.totalorder %s1095_s25, %s1371_s26  ;;  %p1377_p2 = scmp.lt.s32.totalorder %s1371_s26, %s1371_s26 }
   0xb   :  { %1195 = vmatpush3.msra.mxu0 %v1454_v9  ;;  %v149_v25 = vand.u32 4294901760, %v148_v21  ;;  %v113_v26 = vsub.f32 %v111_v17, %v112_v22  ;;  %v156_v27 = vand.u32 4294901760, %v155_v23  ;;  %v163_v30 = vand.u32 4294901760, %v162_v24 }
   0xc   :  { %1210 = vmatprep.subr.mxu0 %v1393_v3  ;;  %v170_v31 = vand.u32 4294901760, %v169_v28  ;;  %v653_v42 = vsub.f32 %v1528_v35, %v652_v38  ;;  %v1555_v45 = vand.u32 4294901760, %v535_v41  ;;  %v660_v48 = vsub.f32 %v1539_v39, %v659_v43  ;;  %p1378_p3 = por %p1377_p2, %p1376_p1 }
   0xd   :  { %1200 = vmatpush3.msra.mxu1 %v149_v25  ;;  %v114_v29 = vand.u32 4294901760, %v113_v26  ;;  %v666_v49 = vand.u32 4294901760, %v1553_v44  ;;  %v1570_v51 = vand.u32 4294901760, %v534_v46  ;;  %v1580_v56 = vand.u32 4294901760, %v533_v52 }
   0xe   :  { %1201 = vmatprep.subr.mxu1 %v1393_v3  ;;  %v654_v47 = vand.u32 4294901760, %v653_v42  ;;  %v1567_v50 = vsub.f32 %v535_v41, %v1555_v45  ;;  %v661_v53 = vand.u32 4294901760, %v660_v48  ;;  %v1596_v62 = vand.u32 4294901760, %v532_v58  ;;  %p1379_p4 = pnand %p1378_p3, %p1372_p0 }
   0xf   :  { %1197 = vmatmul.mubr.f32.vlgmr.msra.gmra.mxu0 %v114_v29  ;;  %1202 = vmatpush3.msra.mxu1 %v156_v27  ;;  %v667_v54 = vsub.f32 %v1553_v44, %v666_v49  ;;  %v1584_v57 = vsub.f32 %v534_v46, %v1570_v51  ;;  %v1594_v61 = vsub.f32 %v533_v52, %v1580_v56  ;;  %v528_v37 = vstv %s1736_s0 }
  0x10   :  { %1211 = vmatpush3.msra.mxu0 %v146_v11  ;;  %1203 = vmatprep.subr.mxu1 %v1393_v3  ;;  %v673_v55 = vand.u32 4294901760, %v1567_v50 }
  0x11   :  { %1212 = vmatprep.subr.mxu0 %v1393_v3  ;;  %1204 = vmatpush3.msra.mxu1 %v163_v30  ;;  %v668_v59 = vand.u32 4294901760, %v667_v54  ;;  %v680_v63 = vand.u32 4294901760, %v1584_v57  ;;  %v687_v2 = vand.u32 4294901760, %v1594_v61 }
  0x12   :  { %1213 = vmatpush3.msra.mxu0 %v153_v13  ;;  %1205 = vmatprep.subr.mxu1 %v1393_v3  ;;  %v674_v60 = vsub.f32 %v1567_v50, %v673_v55 }
  0x13   :  { %1214 = vmatprep.subr.mxu0 %v1393_v3  ;;  %1206 = vmatpush3.msra.mxu1 %v170_v31  ;;  %v688_v7 = vsub.f32 %v1594_v61, %v687_v2 }
  0x14   :  { %1215 = vmatpush3.msra.mxu0 %v160_v14  ;;  %1208 = vmatmul.mubr.f32.vlgmr.msra.gmra.mxu1 %v1463_v12  ;;  %v675_v1 = vand.u32 4294901760, %v674_v60 }
  0x15   :  { %1216 = vmatprep.subr.mxu0 %v1393_v3  ;;  %1221 = vmatprep.subr.mxu1 %v1393_v3  ;;  %v689_v11 = vand.u32 4294901760, %v688_v7 }
  0x16   :  { %1217 = vmatpush3.msra.mxu0 %v167_v15  ;;  %1222 = vmatpush3.msra.mxu1 %v1441_v4 }
  0x17   :  { %1218 = vmatprep.mubr.msk.f32.mxu0 %vm1394_vm1, %v1393_v3  ;;  %1223 = vmatprep.subr.mxu1 %v1393_v3 }
  0x18   :  { %1232 = vmatprep.subr.mxu0 %v1393_v3  ;;  %1219 = vmatmul.mubr.f32.vlgmr.msra.gmra.mxu0 %v111_v17 }
  0x19   :  { %1224 = vmatpush3.msra.mxu1 %v1443_v5  ;;  %1233 = vmatpush3.msra.mxu0 %v147_v16 }
  0x1a   :  { %1225 = vmatprep.subr.mxu1 %v1393_v3  ;;  %1234 = vmatprep.subr.mxu0 %v1393_v3 }
  0x1b   :  { %1226 = vmatpush3.msra.mxu1 %v1445_v6  ;;  %1235 = vmatpush3.msra.mxu0 %v154_v18 }
  0x1c   :  { %1227 = vmatprep.subr.mxu1 %v1393_v3  ;;  %1236 = vmatprep.subr.mxu0 %v1393_v3 }
  0x1d   :  { %1228 = vmatpush3.msra.mxu1 %v1454_v9  ;;  %1229 = vmatprep.mubr.msk.f32.mxu1 %vm1394_vm1, %v1393_v3 }
  0x1e   :  { %1237 = vmatpush3.msra.mxu0 %v161_v19  ;;  %1230 = vmatmul.mubr.f32.vlgmr.msra.gmra.mxu1 %v112_v22 }
  0x1f   :  { %1238 = vmatprep.subr.mxu0 %v1393_v3  ;;  %1243 = vmatprep.subr.mxu1 %v1393_v3 }
  0x20   :  { %1239 = vmatpush3.msra.mxu0 %v168_v20  ;;  %1240 = vmatprep.mubr.msk.f32.mxu0 %vm1394_vm1, %v1393_v3  ;;  %v1102_v20 = vld [vmem:[%s1739_s3] ss:$0 sm:$0xff] }
  0x21   :  { %1244 = vmatpush3.msra.mxu1 %v1441_v4  ;;  %1241 = vmatmul.mubr.f32.vlgmr.msra.gmra.mxu0 %v1463_v12  ;;  %v1607_v4 = vsub.f32 %v532_v58, %v1596_v62 }
  0x22   :  { %1245 = vmatprep.subr.mxu1 %v1393_v3  ;;  %1251 = vmatprep.mubr.msk.f32.mxu1 %vm1394_vm1, %v1393_v3 }
  0x23   :  { %1246 = vmatpush3.msra.mxu1 %v1443_v5  ;;  %1254 = vmatprep.subr.mxu0 %v1393_v3  ;;  %v1609_v5 = vand.u32 4294901760, %v531_v0  ;;  %v694_v8 = vand.u32 4294901760, %v1607_v4 }
  0x24   :  { %1247 = vmatprep.subr.mxu1 %v1393_v3  ;;  %1270 = vmatprep.mubr.msk.f32.mxu0 %vm1394_vm1, %v1393_v3 }
  0x25   :  { %1248 = vmatpush3.msra.mxu1 %v1445_v6  ;;  %1255 = vmatpush3.msra.mxu0 %v1522_v33  ;;  %v681_v6 = vsub.f32 %v1584_v57, %v680_v63 }
  0x26   :  { %1249 = vmatprep.subr.mxu1 %v1393_v3  ;;  %1256 = vmatprep.subr.mxu0 %v1393_v3 }
  0x27   :  { %1250 = vmatpush3.msra.mxu1 %v1454_v9  ;;  %1257 = vmatpush3.msra.mxu0 %v1530_v36  ;;  %v1622_v9 = vsub.f32 %v531_v0, %v1609_v5  ;;  %v682_v10 = vand.u32 4294901760, %v681_v6 }
  0x28   :  { %1252 = vmatmul.mubr.f32.vlgmr.msra.gmra.mxu1 %v1463_v12  ;;  %1273 = vmatprep.subr.mxu1 %v1393_v3  ;;  %v695_v12 = vsub.f32 %v1607_v4, %v694_v8 }
  0x29   :  { %1289 = vmatprep.mubr.msk.f32.mxu1 %vm1394_vm1, %v1393_v3  ;;  %1258 = vmatprep.subr.mxu0 %v1393_v3  ;;  %v701_v13 = vand.u32 4294901760, %v1622_v9 }
  0x2a   :  { %1259 = vmatpush3.msra.mxu0 %v1541_v40  ;;  %1274 = vmatpush3.msra.mxu1 %v654_v47  ;;  %v696_v14 = vand.u32 4294901760, %v695_v12 }
  0x2b   :  { %1260 = vmatprep.subr.mxu0 %v1393_v3  ;;  %1275 = vmatprep.subr.mxu1 %v1393_v3  ;;  %v702_v15 = vsub.f32 %v1622_v9, %v701_v13 }
  0x2c   :  { %1261 = vmatpush3.msra.mxu0 %v1555_v45  ;;  %1276 = vmatpush3.msra.mxu1 %v661_v53 }
  0x2d   :  { %1262 = vmatprep.subr.mxu0 %v1393_v3  ;;  %1277 = vmatprep.subr.mxu1 %v1393_v3  ;;  %v703_v16 = vand.u32 4294901760, %v702_v15 }
  0x2e   :  { %1263 = vmatpush3.msra.mxu0 %v1570_v51  ;;  %1278 = vmatpush3.msra.mxu1 %v668_v59 }
  0x2f   :  { %1264 = vmatprep.subr.mxu0 %v1393_v3  ;;  %1279 = vmatprep.subr.mxu1 %v1393_v3 }
  0x30   :  { %1265 = vmatpush3.msra.mxu0 %v1580_v56  ;;  %1280 = vmatpush3.msra.mxu1 %v675_v1 }
  0x31   :  { %1266 = vmatprep.subr.mxu0 %v1393_v3  ;;  %1281 = vmatprep.subr.mxu1 %v1393_v3 }
  0x32   :  { %1267 = vmatpush3.msra.mxu0 %v1596_v62  ;;  %1282 = vmatpush3.msra.mxu1 %v682_v10 }
  0x33   :  { %1268 = vmatprep.subr.mxu0 %v1393_v3  ;;  %1283 = vmatprep.subr.mxu1 %v1393_v3 }
  0x34   :  { %1269 = vmatpush3.msra.mxu0 %v1609_v5  ;;  %1284 = vmatpush3.msra.mxu1 %v689_v11 }
  0x35   :  { %1292 = vmatprep.subr.mxu0 %v1393_v3  ;;  %1285 = vmatprep.subr.mxu1 %v1393_v3 }
  0x36   :  { %1286 = vmatpush3.msra.mxu1 %v696_v14 }
  0x37   :  { %1287 = vmatprep.subr.mxu1 %v1393_v3 }
  0x38   :  { %1288 = vmatpush3.msra.mxu1 %v703_v16 }
  0x39   :  { %1311 = vmatprep.subr.mxu1 %v1393_v3 }
  0xcf   :  { %v116_v17 = vpop.f32.mrf.mxu0 }
  0xd0   :  { %v117_v23 = vadd.f32 %v1102_v20, %v116_v17 }
  0xd1   :  { %v1198_v18 = vpop.f32.mrf.mxu0 }
  0xd4   :  { %v207_v19 = vpop.f32.mrf.mxu1 }
  0xd5   :  { %v208_v25 = vadd.f32 %v207_v19, %v117_v23 }
  0xd6   :  { %v1209_v21 = vpop.f32.mrf.mxu1 }
  0xd8   :  { %v287_v22 = vpop.f32.mrf.mxu0 }
  0xd9   :  { %v288_v28 = vadd.f32 %v287_v22, %v208_v25 }
  0xda   :  { %v1220_v24 = vpop.f32.mrf.mxu0 }
  0xde   :  { %v364_v26 = vpop.f32.mrf.mxu1 }
  0xdf   :  { %v365_v30 = vadd.f32 %v364_v26, %v288_v28 }
  0xe0   :  { %v1231_v27 = vpop.f32.mrf.mxu1 }
  0xe1   :  { %v447_v29 = vpop.f32.mrf.mxu0 }
  0xe2   :  { %v448_v32 = vadd.f32 %v447_v29, %v365_v30 }
  0xe3   :  { %v1242_v31 = vpop.f32.mrf.mxu0 }
  0xe8   :  { %v522_v34 = vpop.f32.mrf.mxu1 }
  0xe9   :  { %v523_v41 = vadd.f32 %v522_v34, %v448_v32 }
  0xea   :  { %v1253_v42 = vpop.f32.mrf.mxu1 }
  0xeb   :  { %vm527_vm2 = vcmp.ge.f32.partialorder %v523_v41, 0.0  ;;  %v529_v46 = vmul.f32 %v528_v37, %v523_v41 }
  0xed   :  { %v530_v47 = vsel %vm527_vm2, %v523_v41, %v529_v46 }
  0xee   :  { %v548_v48 = vsel %vm546_vm3, %v530_v47, 0 }
  0xef   :  { %v1645_v52 = vand.u32 4294901760, %v548_v48 }
  0xf1   :  { %v624_v53 = vsub.f32 %v548_v48, %v1645_v52  ;;  %1290 = vmatmul.mubr.f32.vlgmr.msra.gmra.mxu1 %v1645_v52 }
  0xf2   :  { %1312 = vmatpush3.msra.mxu1 %v1522_v33  ;;  %1327 = vmatprep.mubr.msk.f32.mxu1 %vm1394_vm1, %v1393_v3 }
  0xf3   :  { %1313 = vmatprep.subr.mxu1 %v1393_v3  ;;  %v625_v54 = vand.u32 4294901760, %v624_v53 }
  0xf4   :  { %1314 = vmatpush3.msra.mxu1 %v1530_v36 }
  0xf5   :  { %1315 = vmatprep.subr.mxu1 %v1393_v3  ;;  %v626_v58 = vsub.f32 %v624_v53, %v625_v54 }
  0xf6   :  { %1316 = vmatpush3.msra.mxu1 %v1541_v40 }
  0xf7   :  { %1317 = vmatprep.subr.mxu1 %v1393_v3  ;;  %v627_v59 = vand.u32 4294901760, %v626_v58 }
  0xf8   :  { %1318 = vmatpush3.msra.mxu1 %v1555_v45 }
  0xf9   :  { %1319 = vmatprep.subr.mxu1 %v1393_v3  ;;  %1271 = vmatmul.mubr.f32.vlgmr.msra.gmra.mxu0 %v627_v59 }
  0xfa   :  { %1293 = vmatpush3.msra.mxu0 %v1528_v35  ;;  %1320 = vmatpush3.msra.mxu1 %v1570_v51 }
  0xfb   :  { %1294 = vmatprep.subr.mxu0 %v1393_v3  ;;  %1321 = vmatprep.subr.mxu1 %v1393_v3 }
  0xfc   :  { %1295 = vmatpush3.msra.mxu0 %v1539_v39  ;;  %1322 = vmatpush3.msra.mxu1 %v1580_v56 }
  0xfd   :  { %1296 = vmatprep.subr.mxu0 %v1393_v3  ;;  %1323 = vmatprep.subr.mxu1 %v1393_v3 }
  0xfe   :  { %1297 = vmatpush3.msra.mxu0 %v1553_v44  ;;  %1324 = vmatpush3.msra.mxu1 %v1596_v62 }
  0xff   :  { %1298 = vmatprep.subr.mxu0 %v1393_v3  ;;  %1325 = vmatprep.subr.mxu1 %v1393_v3 }
 0x100   :  { %1299 = vmatpush3.msra.mxu0 %v1567_v50  ;;  %1326 = vmatpush3.msra.mxu1 %v1609_v5 }
 0x101   :  { %1300 = vmatprep.subr.mxu0 %v1393_v3  ;;  %1328 = vmatmul.mubr.f32.vlgmr.msra.gmra.mxu1 %v625_v54 }
 0x102   :  { %1349 = vmatprep.subr.mxu1 %v1393_v3  ;;  %1301 = vmatpush3.msra.mxu0 %v1584_v57 }
 0x103   :  { %1350 = vmatpush3.msra.mxu1 %v1522_v33  ;;  %1302 = vmatprep.subr.mxu0 %v1393_v3 }
 0x104   :  { %1351 = vmatprep.subr.mxu1 %v1393_v3  ;;  %1303 = vmatpush3.msra.mxu0 %v1594_v61 }
 0x105   :  { %1352 = vmatpush3.msra.mxu1 %v1530_v36  ;;  %1304 = vmatprep.subr.mxu0 %v1393_v3 }
 0x106   :  { %1353 = vmatprep.subr.mxu1 %v1393_v3  ;;  %1305 = vmatpush3.msra.mxu0 %v1607_v4 }
 0x107   :  { %1354 = vmatpush3.msra.mxu1 %v1541_v40  ;;  %1306 = vmatprep.subr.mxu0 %v1393_v3 }
 0x108   :  { %1355 = vmatprep.subr.mxu1 %v1393_v3  ;;  %1307 = vmatpush3.msra.mxu0 %v1622_v9 }
 0x109   :  { %1308 = vmatprep.mubr.msk.f32.mxu0 %vm1394_vm1, %v1393_v3  ;;  %1356 = vmatpush3.msra.mxu1 %v1555_v45  ;;  %v1103_v45 = vld [vmem:[%s1741_s5] ss:$0 sm:$0xff] }
 0x10a   :  { %1309 = vmatmul.mubr.f32.vlgmr.msra.gmra.mxu0 %v624_v53  ;;  %1330 = vmatprep.subr.mxu0 %v1393_v3 }
 0x10b   :  { %1357 = vmatprep.subr.mxu1 %v1393_v3  ;;  %1331 = vmatpush3.msra.mxu0 %v652_v38 }
 0x10c   :  { %1358 = vmatpush3.msra.mxu1 %v1570_v51  ;;  %1332 = vmatprep.subr.mxu0 %v1393_v3 }
 0x10d   :  { %1359 = vmatprep.subr.mxu1 %v1393_v3  ;;  %1333 = vmatpush3.msra.mxu0 %v659_v43 }
 0x10e   :  { %1360 = vmatpush3.msra.mxu1 %v1580_v56  ;;  %1334 = vmatprep.subr.mxu0 %v1393_v3 }
 0x10f   :  { %1361 = vmatprep.subr.mxu1 %v1393_v3  ;;  %1335 = vmatpush3.msra.mxu0 %v666_v49 }
 0x110   :  { %1362 = vmatpush3.msra.mxu1 %v1596_v62  ;;  %1336 = vmatprep.subr.mxu0 %v1393_v3 }
 0x111   :  { %1363 = vmatprep.subr.mxu1 %v1393_v3  ;;  %1337 = vmatpush3.msra.mxu0 %v673_v55 }
 0x112   :  { %1364 = vmatpush3.msra.mxu1 %v1609_v5  ;;  %1365 = vmatprep.mubr.msk.f32.mxu1 %vm1394_vm1, %v1393_v3 }
 0x113   :  { %1338 = vmatprep.subr.mxu0 %v1393_v3  ;;  %1366 = vmatmul.mubr.f32.vlgmr.msra.gmra.mxu1 %v1645_v52 }
 0x114   :  { %1339 = vmatpush3.msra.mxu0 %v680_v63  ;;  %1346 = vmatprep.mubr.msk.f32.mxu0 %vm1394_vm1, %v1393_v3 }
 0x115   :  { %1340 = vmatprep.subr.mxu0 %v1393_v3 }
 0x116   :  { %1341 = vmatpush3.msra.mxu0 %v687_v2 }
 0x117   :  { %1342 = vmatprep.subr.mxu0 %v1393_v3 }
 0x118   :  { %1343 = vmatpush3.msra.mxu0 %v694_v8 }
 0x119   :  { %1344 = vmatprep.subr.mxu0 %v1393_v3 }
 0x11a   :  { %1345 = vmatpush3.msra.mxu0 %v701_v13 }
 0x11b   :  { %1347 = vmatmul.mubr.f32.vlgmr.msra.gmra.mxu0 %v1645_v52 }
 0x1b1   :  { %v740_v33 = vpop.f32.mrf.mxu1 }
 0x1b3   :  { %v1291_v35 = vpop.f32.mrf.mxu1 }
 0x1b9   :  { %v629_v36 = vpop.f32.mrf.mxu0 }
 0x1ba   :  { %v630_v49 = vadd.f32 %v1103_v45, %v629_v36 }
 0x1bb   :  { %v1272_v38 = vpop.f32.mrf.mxu0 }
 0x1bc   :  { %v741_v3 = vadd.f32 %v740_v33, %v630_v49 }
 0x1c1   :  { %v909_v39 = vpop.f32.mrf.mxu1 }
 0x1c3   :  { %v1329_v40 = vpop.f32.mrf.mxu1 }
 0x1ca   :  { %v828_v43 = vpop.f32.mrf.mxu0 }
 0x1cb   :  { %v829_v55 = vadd.f32 %v828_v43, %v741_v3 }
 0x1cc   :  { %v1310_v44 = vpop.f32.mrf.mxu0 }
 0x1cd   :  { %v910_v56 = vadd.f32 %v909_v39, %v829_v55 }
 0x1d3   :  { %v1083_v50 = vpop.f32.mrf.mxu1 }
 0x1d5   :  { %v1367_v51 = vpop.f32.mrf.mxu1 }
 0x1db   :  { %v1004_v57 = vpop.f32.mrf.mxu0 }
 0x1dc   :  { %v1005_v60 = vadd.f32 %v1004_v57, %v910_v56 }
 0x1dd   :  { %v1348_v61 = vpop.f32.mrf.mxu0 }
 0x1de   :  { %v1084_v62 = vadd.f32 %v1083_v50, %v1005_v60 }
 0x1e0   :  { %1087 = vst.msk [vmem:[#allocation3] sm:$0xff] %vm37_vm0, %v1084_v62 }
 0x1e1   :  { %1382 = shalt.err (!%p1379_p4)
}
 0x1e2   :  { %1097 = dma.vmem_to_hbm [thread:$0]  %s1095_s25, 128, %s1742_s6, [#allocation4]  }
 0x1e3   :  { %1391 = dma.done.wait [#allocation4], 128  }
 0x1e4   :  { %1392 = vsyncadd [#allocation4], 4294967168 }
 0x1e5   :  { %1101 = vsyncpa [#allocation4], 1 }

</bundles_post_ra>
